<compile_context>
chip_gen: v6e
topology: v6e:2x2x1
jax: 0.10.0
libtpu: 0.0.40
codegen_flags: <defaults>
</compile_context>

<pallas_src>
from functools import partial

import jax
import jax.numpy as jnp
from jax.experimental import pallas as pl
from jax.experimental.pallas import tpu as pltpu


# ------------------------------ kernels ------------------------------------ #

def qkv_proj_kernel(x_ref, w_ref, b_ref, o_ref, acc_ref):
    """o[i, j] = sum_k x[i, k] @ w[k, j] + b[j]; K-tiled, f32 accumulator."""
    @pl.when(pl.program_id(2) == 0)
    def _():
        acc_ref[...] = jnp.zeros_like(acc_ref)

    acc_ref[...] += jnp.dot(x_ref[...], w_ref[...],
                            preferred_element_type=jnp.float32)

    @pl.when(pl.program_id(2) == pl.num_programs(2) - 1)
    def _():
        o_ref[...] = (acc_ref[...] + b_ref[...]).astype(o_ref.dtype)


def attention_kernel(qkv_ref, aq_ref, bq_ref, ak_ref, bk_ref, mask_ref, o_ref,
                     *, num_head, head_dim):
    # qkv_ref: (n_t, 3C) tile of one batch element (lane-dense).
    # aq/bq/ak/bk: (n_t, C) folded PE coefficients (resident across the grid).
    # mask_ref:   (n_t, n_t) int32, 1 = attend.
    # o_ref:      (n_t, C) output tile, written in final (n_b, n_t, C) layout.
    n_t = qkv_ref.shape[0]
    C = num_head * head_dim
    in_dtype = qkv_ref.dtype

    q = qkv_ref[:, 0:C].astype(jnp.float32)
    k = qkv_ref[:, C:2 * C].astype(jnp.float32)
    v = qkv_ref[:, 2 * C:3 * C]

    # Pair swap within each head (column j <-> j^1) via two XLU rolls and a
    # lane-parity select.  The select mask is derived by rolling the lane iota
    # with the same primitive, so it is correct regardless of roll direction
    # convention.  The +/-1 rotation sign is folded into bq/bk in the wrapper.
    lane = jax.lax.broadcasted_iota(jnp.int32, (n_t, C), 1)
    partner = lane + 1 - 2 * (lane % 2)                       # lane XOR 1
    take_r1 = pltpu.roll(lane, shift=1, axis=1) == partner

    def pair_swap(x):
        return jnp.where(take_r1,
                         pltpu.roll(x, shift=1, axis=1),
                         pltpu.roll(x, shift=C - 1, axis=1))

    # q <- ((q*pe0 + rot(q)*pe1) * pe2) * (1/sqrt(2d))   (folded into aq/bq)
    # k <-  (k*pe0 + rot(k)*pe1) / pe2                   (folded into ak/bk)
    q = q * aq_ref[...] + pair_swap(q) * bq_ref[...]
    k = k * ak_ref[...] + pair_swap(k) * bk_ref[...]
    q = q.astype(in_dtype)      # keep model dtype (e.g. bf16) on the MXU
    k = k.astype(in_dtype)

    attend = mask_ref[...] != 0                               # (n_t, n_t)
    neg_big = jnp.float32(-1e30)   # finite "-inf": fully-masked rows produce a
                                   # uniform softmax instead of NaN

    # TODO(synk): for long sequences add flash-style online-softmax kv tiling
    # (mandatory on v7x where VMEM is 64 MiB); whole (n_t, n_t) score rows are
    # fine at these sizes.
    outs = []
    for h in range(num_head):      # static unroll; heads share the lane dim
        cols = slice(h * head_dim, (h + 1) * head_dim)
        s = jax.lax.dot_general(q[:, cols], k[:, cols],
                                (((1,), (1,)), ((), ())),
                                preferred_element_type=jnp.float32)
        s = jnp.where(attend, s, neg_big)
        m = jnp.max(s, axis=-1, keepdims=True)
        e = jnp.exp(s - m)
        denom = jnp.sum(e, axis=-1, keepdims=True)
        # EUP reciprocal instead of an elementwise divide.  approx=True is fine
        # for bf16 outputs; keep the exact form for the f32 tolerance check.
        p = (e * pl.reciprocal(denom, approx=False)).astype(v.dtype)
        outs.append(jnp.dot(p, v[:, cols], preferred_element_type=jnp.float32))

    # single lane-dense store of all heads
    o_ref[...] = jnp.concatenate(outs, axis=-1).astype(o_ref.dtype)


# ------------------------------ wrapper ------------------------------------ #

def _pick_tile(dim, cap, quantum):
    """Largest tile <= cap dividing `dim` that is a multiple of `quantum`;
    falls back to the full dim (always a legal block shape)."""
    if dim <= cap:
        return dim
    for t in range(cap, quantum - 1, -1):
        if dim % t == 0 and t % quantum == 0:
            return t
    return dim


def attention_forward(x, pe, mask, w_qkv, b_qkv, num_head):
    """x: (n_b, n_t, C); pe: 3-tuple of (1, 1, n_t, d); mask: bool
    (1, n_b, n_t, n_t) with True = attend (torch SDPA bool semantics) or None;
    w_qkv: (3C, C); b_qkv: (3C,)."""
    n_b, n_t, C = x.shape
    assert C % num_head == 0
    d = C // num_head
    assert d % 2 == 0
    scale = 1.0 / ((2.0 * d) ** 0.5)
    R = n_b * n_t

    # ---- QKV linear projection: (R, C) @ (C, 3C) + b, tiled MXU matmul ----
    w_t = jnp.asarray(w_qkv).T.astype(x.dtype)              # (C, 3C)
    bias2d = jnp.asarray(b_qkv).reshape(1, 3 * C).astype(jnp.float32)
    x_flat = x.reshape(R, C)

    tm = _pick_tile(R, 256, 8)
    tn = _pick_tile(3 * C, 512, 128)
    tk = _pick_tile(C, 512, 128)

    qkv = pl.pallas_call(
        qkv_proj_kernel,
        out_shape=jax.ShapeDtypeStruct((R, 3 * C), x.dtype),
        grid=(R // tm, (3 * C) // tn, C // tk),
        in_specs=[
            pl.BlockSpec((tm, tk), lambda i, j, k: (i, k)),
            pl.BlockSpec((tk, tn), lambda i, j, k: (k, j)),
            pl.BlockSpec((1, tn), lambda i, j, k: (0, j)),
        ],
        out_specs=pl.BlockSpec((tm, tn), lambda i, j, k: (i, j)),
        scratch_shapes=[pltpu.VMEM((tm, tn), jnp.float32)],
        compiler_params=pltpu.CompilerParams(
            dimension_semantics=("parallel", "parallel", "arbitrary")),
    )(x_flat, w_t, bias2d)

    # ---- fold PE, rotation sign, 1/sqrt(2d) and 1/pe2 into coefficient maps
    pe0 = jnp.asarray(pe[0], jnp.float32).reshape(n_t, d)
    pe1 = jnp.asarray(pe[1], jnp.float32).reshape(n_t, d)
    pe2 = jnp.asarray(pe[2], jnp.float32).reshape(n_t, d)
    sign = jnp.where(jnp.arange(d) % 2 == 0, -1.0, 1.0)     # rot = pair_swap * sign
    pe1s = pe1 * sign
    aq = jnp.tile(pe0 * pe2 * scale, (1, num_head))          # (n_t, C)
    bq = jnp.tile(pe1s * pe2 * scale, (1, num_head))
    ak = jnp.tile(pe0 / pe2, (1, num_head))
    bk = jnp.tile(pe1s / pe2, (1, num_head))

    # ---- mask: int32 (n_b, n_t, n_t), 1 = attend; read once per batch ----
    if mask is None:
        mask_i32 = jnp.ones((n_b, n_t, n_t), jnp.int32)
    else:
        mask_i32 = jnp.broadcast_to(mask, (1, n_b, n_t, n_t))[0].astype(jnp.int32)

    # ---- attention: one grid step per batch, all heads in the lane dim ----
    out = pl.pallas_call(
        partial(attention_kernel, num_head=num_head, head_dim=d),
        out_shape=jax.ShapeDtypeStruct((n_b, n_t, C), x.dtype),
        grid=(n_b,),
        in_specs=[
            pl.BlockSpec((n_t, 3 * C), lambda b: (b, 0)),         # qkv rows of batch b
            pl.BlockSpec((n_t, C), lambda b: (0, 0)),             # aq (resident)
            pl.BlockSpec((n_t, C), lambda b: (0, 0)),             # bq
            pl.BlockSpec((n_t, C), lambda b: (0, 0)),             # ak
            pl.BlockSpec((n_t, C), lambda b: (0, 0)),             # bk
            pl.BlockSpec((None, n_t, n_t), lambda b: (b, 0, 0)),  # mask of batch b
        ],
        out_specs=pl.BlockSpec((None, n_t, C), lambda b: (b, 0, 0)),
        compiler_params=pltpu.CompilerParams(
            dimension_semantics=("parallel",)),
    )(qkv, aq, bq, ak, bk, mask_i32)

    return out


# ------------------------------ reference ---------------------------------- #

def attention_reference(x, pe, mask, w_qkv, b_qkv, num_head):
    n_b, n_t, C = x.shape
    d = C // num_head
    tp = (2.0 * d) ** 0.5
    qkv = x @ w_qkv.T + b_qkv
    q, k, v = jnp.split(qkv, 3, axis=-1)

    def to_heads(t):
        return t.reshape(n_b, n_t, num_head, d).transpose(2, 0, 1, 3)

    q, k, v = to_heads(q), to_heads(k), to_heads(v)

    def rotate(t):
        tr = jnp.zeros_like(t)
        tr = tr.at[..., 0::2].set(-t[..., 1::2])
        tr = tr.at[..., 1::2].set(t[..., 0::2])
        return tr

    pe0, pe1, pe2 = pe
    qn = (q * pe0 + rotate(q) * pe1) * pe2
    kn = (k * pe0 + rotate(k) * pe1) / pe2
    s = jnp.einsum("hbtd,hbsd->hbts", qn, kn) / tp
    if mask is not None:
        s = jnp.where(mask, s, -jnp.inf)  # True = attend (torch SDPA bool semantics)
    a = jax.nn.softmax(s, axis=-1)
    o = jnp.einsum("hbts,hbsd->hbtd", a, v)
    return o.transpose(1, 2, 0, 3).reshape(n_b, n_t, C)


# --------------------------------- main ------------------------------------ #

if __name__ == "__main__":
    n_b, n_t, C, nh = 2, 16, 128, 8
    d = C // nh

    key = jax.random.PRNGKey(0)
    k1, k2, k3, k4 = jax.random.split(key, 4)

    x = jax.random.normal(k1, (n_b, n_t, C), jnp.float32)
    # deterministic "Linear(channel, channel*3)" params
    w_qkv = jax.random.normal(k2, (3 * C, C), jnp.float32) * (1.0 / C ** 0.5)
    b_qkv = jax.random.normal(k3, (3 * C,), jnp.float32) * 0.01

    # rotary-style position encoding, each (1, 1, n_t, d)
    pos = jnp.arange(n_t, dtype=jnp.float32)[:, None]
    inv_freq = 1.0 / (10000.0 ** (jnp.arange(0, d, 2, dtype=jnp.float32) / d))
    theta = jnp.repeat(pos * inv_freq, 2, axis=-1)            # (n_t, d)
    pe0 = jnp.cos(theta).reshape(1, 1, n_t, d)
    pe1 = jnp.sin(theta).reshape(1, 1, n_t, d)
    pe2 = (1.0 + 0.1 * jax.random.uniform(k4, (1, 1, n_t, d))).astype(jnp.float32)
    pe = (pe0, pe1, pe2)

    # boolean attention mask (1, n_b, n_t, n_t): True = attend (causal pattern)
    causal = jnp.arange(n_t)[None, :] <= jnp.arange(n_t)[:, None]
    mask = jnp.broadcast_to(causal, (1, n_b, n_t, n_t))

    out = attention_forward(x, pe, mask, w_qkv, b_qkv, nh)
    jax.block_until_ready(out)

    ref = attention_reference(x, pe, mask, w_qkv, b_qkv, nh)
    assert out.shape == (n_b, n_t, C)
    err = float(jnp.max(jnp.abs(out - ref)))
    assert err < 1e-4, f"max abs err {err}"
    print("KERNEL_OK")
</pallas_src>

<mosaic_0001>
module attributes {stable_mosaic.version = 11 : i64} {
  func.func @qkv_proj_kernel(%arg0: i32, %arg1: i32, %arg2: i32, %arg3: memref<32x128xf32, #tpu.memory_space<vmem>>, %arg4: memref<128x384xf32, #tpu.memory_space<vmem>>, %arg5: memref<1x384xf32, #tpu.memory_space<vmem>>, %arg6: memref<32x384xf32, #tpu.memory_space<vmem>>, %arg7: memref<32x384xf32, #tpu.memory_space<vmem>>) attributes {dimension_semantics = [#tpu.dimension_semantics<parallel>, #tpu.dimension_semantics<parallel>, #tpu.dimension_semantics<arbitrary>], iteration_bounds = array<i64: 1, 1, 1>, scalar_prefetch = 0 : i64, scratch_operands = 1 : i64, tpu.core_type = #tpu.core_type<tc>, window_params = [{transform_indices = @transform_0, window_bounds = array<i64: 32, 128>}, {transform_indices = @transform_1, window_bounds = array<i64: 128, 384>}, {transform_indices = @transform_2, window_bounds = array<i64: 1, 384>}, {transform_indices = @transform_3, window_bounds = array<i64: 32, 384>}]} {
    %c0_i32 = arith.constant 0 : i32
    %0 = arith.cmpi eq, %arg2, %c0_i32 : i32
    %1 = arith.extui %0 : i1 to i32
    %c0_i32_0 = arith.constant 0 : i32
    %2 = arith.cmpi ne, %1, %c0_i32_0 : i32
    scf.if %2 {
      %cst_10 = arith.constant 0.000000e+00 : f32
      %12 = vector.broadcast %cst_10 : f32 to vector<32x384xf32>
      %c0_11 = arith.constant 0 : index
      %c0_12 = arith.constant 0 : index
      %13 = vector.load %arg7[%c0_11, %c0_12] : memref<32x384xf32, #tpu.memory_space<vmem>>, vector<32x384xf32>
      tpu.vector_store %arg7[%c0_11, %c0_12], %12 {strides = array<i32>} : memref<32x384xf32, #tpu.memory_space<vmem>>, vector<32x384xf32>,
    } else {
    }
    %c0 = arith.constant 0 : index
    %c0_1 = arith.constant 0 : index
    %3 = vector.load %arg7[%c0, %c0_1] : memref<32x384xf32, #tpu.memory_space<vmem>>, vector<32x384xf32>
    %c0_2 = arith.constant 0 : index
    %c0_3 = arith.constant 0 : index
    %4 = vector.load %arg3[%c0_2, %c0_3] : memref<32x128xf32, #tpu.memory_space<vmem>>, vector<32x128xf32>
    %c0_4 = arith.constant 0 : index
    %c0_5 = arith.constant 0 : index
    %5 = vector.load %arg4[%c0_4, %c0_5] : memref<128x384xf32, #tpu.memory_space<vmem>>, vector<128x384xf32>
    %cst = arith.constant dense<0.000000e+00> : vector<32x384xf32>
    %6 = tpu.matmul %4, %5, %cst {dimension_numbers = #tpu.dot_dimension_numbers<[1], [0], [0], [1], [0, 0, 1, 1], [], []>} : vector<32x128xf32>, vector<128x384xf32>, vector<32x384xf32> -> vector<32x384xf32>
    %7 = arith.addf %3, %6 : vector<32x384xf32>
    %c0_6 = arith.constant 0 : index
    %c0_7 = arith.constant 0 : index
    %8 = vector.load %arg7[%c0_6, %c0_7] : memref<32x384xf32, #tpu.memory_space<vmem>>, vector<32x384xf32>
    tpu.vector_store %arg7[%c0_6, %c0_7], %7 {strides = array<i32>} : memref<32x384xf32, #tpu.memory_space<vmem>>, vector<32x384xf32>,
    %c0_i32_8 = arith.constant 0 : i32
    %9 = arith.cmpi eq, %arg2, %c0_i32_8 : i32
    %10 = arith.extui %9 : i1 to i32
    %c0_i32_9 = arith.constant 0 : i32
    %11 = arith.cmpi ne, %10, %c0_i32_9 : i32
    scf.if %11 {
      %c0_10 = arith.constant 0 : index
      %c0_11 = arith.constant 0 : index
      %12 = vector.load %arg7[%c0_10, %c0_11] : memref<32x384xf32, #tpu.memory_space<vmem>>, vector<32x384xf32>
      %c0_12 = arith.constant 0 : index
      %c0_13 = arith.constant 0 : index
      %13 = vector.load %arg5[%c0_12, %c0_13] : memref<1x384xf32, #tpu.memory_space<vmem>>, vector<1x384xf32>
      %14 = vector.broadcast %13 : vector<1x384xf32> to vector<32x384xf32>
      %15 = arith.addf %12, %14 : vector<32x384xf32>
      %c0_14 = arith.constant 0 : index
      %c0_15 = arith.constant 0 : index
      %16 = vector.load %arg6[%c0_14, %c0_15] : memref<32x384xf32, #tpu.memory_space<vmem>>, vector<32x384xf32>
      tpu.vector_store %arg6[%c0_14, %c0_15], %15 {strides = array<i32>} : memref<32x384xf32, #tpu.memory_space<vmem>>, vector<32x384xf32>,
    } else {
    }
    return
  }
  func.func @transform_0(%arg0: i32, %arg1: i32, %arg2: i32) -> (i32, i32) {
    %c0_i32 = arith.constant 0 : i32
    return %arg0, %arg2 : i32, i32
  }
  func.func @transform_1(%arg0: i32, %arg1: i32, %arg2: i32) -> (i32, i32) {
    %c0_i32 = arith.constant 0 : i32
    return %arg2, %arg1 : i32, i32
  }
  func.func @transform_2(%arg0: i32, %arg1: i32, %arg2: i32) -> (i32, i32) {
    %c0_i32 = arith.constant 0 : i32
    %c0_i32_0 = arith.constant 0 : i32
    return %c0_i32, %arg1 : i32, i32
  }
  func.func @transform_3(%arg0: i32, %arg1: i32, %arg2: i32) -> (i32, i32) {
    %c0_i32 = arith.constant 0 : i32
    return %arg0, %arg1 : i32, i32
  }
}

</mosaic_0001>

<bundles_post_ra>
// kernel: tpu_custom_call.1
= control target key start
LH: loop header
LB: loop body
LE: loop exit
PB: predicated region body
PF: predicated region fallthrough
CT: control target
= control target key end

     0   :  { %8 = vsyncpa [#allocation4], 0  ;;  %s577_s0 = inlined_call_operand.hbm [shape: f32[32,128], index: 0, kind: input, shape index: {}]   ;;  %s578_s1 = inlined_call_operand.hbm [shape: f32[128,384], index: 1, kind: input, shape index: {}]   ;;  %s579_s2 = inlined_call_operand.vmem [shape: f32[1,384], index: 2, kind: input, shape index: {}]   ;;  %s580_s3 = inlined_call_operand.hbm [shape: f32[32,384], index: 3, kind: output, shape index: {}]  }
   0x1   :  { %9 = vsyncpa [#allocation7], 0 }
   0x2   :  { %10 = vsyncpa [#allocation5], 0  ;;  %s527_s12 = smov [#allocation3]  }
   0x3   :  { %s16_s13 = sshll.u32 %s527_s12, 4  ;;  %s17_s13 = int_to_ptr.vmem [resolvable:$true] %s16_s13 }
   0x4   :  { %s469_s14 = scalar_lea.vmem %s17_s13, 512  ;;  %p474_p1 = scmp.lt.s32.totalorder %s17_s13, %s17_s13 }
   0x5   :  { %p470_p0 = scmp.ne.s32.totalorder %s17_s13, %s469_s14  ;;  %p475_p2 = scmp.lt.s32.totalorder %s469_s14, %s469_s14 }
   0x7   :  { %p476_p3 = por %p475_p2, %p474_p1 }
   0x9   :  { %p477_p4 = pnand %p476_p3, %p470_p0 }
   0xb   :  { %480 = shalt.err (!%p477_p4)
}
   0xc   :  { %s528_s15 = smov 128   ;;  %s529_s16 = smov 8  }
   0xd   :  { %22 = dma.hbm_to_vmem [thread:$0]  %s577_s0, 512, %s17_s13, [#allocation4], %s528_s15, %s528_s15, %s529_s16  }
   0xe   :  { %s530_s19 = smov [#allocation6]  }
   0xf   :  { %s28_s20 = sshll.u32 %s530_s19, 4  ;;  %s29_s20 = int_to_ptr.vmem [resolvable:$true] %s28_s20 }
  0x10   :  { %s489_s21 = scalar_lea.vmem %s29_s20, 6144  ;;  %p494_p6 = scmp.lt.s32.totalorder %s29_s20, %s29_s20 }
  0x11   :  { %p490_p5 = scmp.ne.s32.totalorder %s29_s20, %s489_s21  ;;  %p495_p7 = scmp.lt.s32.totalorder %s489_s21, %s489_s21 }
  0x13   :  { %p496_p8 = por %p495_p7, %p494_p6 }
  0x15   :  { %p497_p9 = pnand %p496_p8, %p490_p5 }
  0x17   :  { %500 = shalt.err (!%p497_p9)
}
  0x18   :  { %s531_s22 = smov 384   ;;  %s532_s23 = smov 24  }
  0x19   :  { %34 = dma.hbm_to_vmem [thread:$0]  %s578_s1, 6144, %s29_s20, [#allocation7], %s531_s22, %s531_s22, %s532_s23  }
  0x1a   :  { %521 = dma.done.wait [#allocation4], 512  }
  0x1b   :  { %522 = vsyncadd [#allocation4], 4294966784 }
  0x1c   :  { %523 = dma.done.wait [#allocation7], 6144  }
  0x1d   :  { %524 = vsyncadd [#allocation7], 4294961152  ;;  %v533_v0 = vmov 0.0   ;;  %v121_v1 = vld [vmem:[#allocation6 + $0x170] sm:$0xff]  ;;  %v120_v2 = vld [vmem:[#allocation6 + $0x168] sm:$0xff]  ;;  %v338_v53 = vlaneseq }
  0x1e   :  { %187 = vmatprep.mubr.f32.mxu0 %v533_v0  ;;  %v118_v3 = vld [vmem:[#allocation6 + $0x158] sm:$0xff]  ;;  %123 = vmatprep.subr.mxu0 %v121_v1  ;;  %v117_v4 = vld [vmem:[#allocation6 + $0x150] sm:$0xff]  ;;  %v115_v5 = vld [vmem:[#allocation6 + $0x140] sm:$0xff] }
  0x1f   :  { %124 = vmatpush1.msra.mxu0 %v120_v2  ;;  %v122_v6 = vld [vmem:[#allocation6 + $0x178] sm:$0xff]  ;;  %v119_v8 = vld [vmem:[#allocation6 + $0x160] sm:$0xff]  ;;  %v112_v9 = vld [vmem:[#allocation6 + $0x128] sm:$0xff]  ;;  %v339_v54 = vshrl.u32 %v338_v53, 7 }
  0x20   :  { %125 = vmatprep.subr.mxu0 %v118_v3  ;;  %v114_v7 = vld [vmem:[#allocation6 + $0x138] sm:$0xff]  ;;  %415 = vmatprep.subr.mxu1 %v122_v6  ;;  %v116_v10 = vld [vmem:[#allocation6 + $0x148] sm:$0xff]  ;;  %v111_v11 = vld [vmem:[#allocation6 + $0x120] sm:$0xff] }
  0x21   :  { %126 = vmatpush1.msra.mxu0 %v117_v4  ;;  %416 = vmatpush3.msra.mxu1 %v122_v6  ;;  %v109_v12 = vld [vmem:[#allocation6 + $0x110] sm:$0xff]  ;;  %v108_v14 = vld [vmem:[#allocation6 + $0x108] sm:$0xff]  ;;  %v106_v15 = vld [vmem:[#allocation6 + $0xf8] sm:$0xff]  ;;  %v340_v55 = vsub.s32 0, %v339_v54  ;;  %v344_v57 = vsub.s32 1, %v339_v54  ;;  %v348_v58 = vsub.s32 2, %v339_v54 }
  0x22   :  { %127 = vmatprep.subr.mxu0 %v115_v5  ;;  %417 = vmatprep.subr.mxu1 %v119_v8  ;;  %v113_v13 = vld [vmem:[#allocation6 + $0x130] sm:$0xff]  ;;  %v110_v16 = vld [vmem:[#allocation6 + $0x118] sm:$0xff]  ;;  %v103_v18 = vld [vmem:[#allocation6 + $0xe0] sm:$0xff] }
  0x23   :  { %128 = vmatpush1.msra.mxu0 %v114_v7  ;;  %418 = vmatpush3.msra.mxu1 %v119_v8  ;;  %v105_v17 = vld [vmem:[#allocation6 + $0xf0] sm:$0xff]  ;;  %v107_v19 = vld [vmem:[#allocation6 + $0x100] sm:$0xff]  ;;  %v102_v20 = vld [vmem:[#allocation6 + $0xd8] sm:$0xff] }
  0x24   :  { %129 = vmatprep.subr.mxu0 %v112_v9  ;;  %419 = vmatprep.subr.mxu1 %v116_v10  ;;  %v100_v21 = vld [vmem:[#allocation6 + $0xc8] sm:$0xff]  ;;  %v99_v23 = vld [vmem:[#allocation6 + $0xc0] sm:$0xff]  ;;  %v97_v24 = vld [vmem:[#allocation6 + $0xb0] sm:$0xff] }
  0x25   :  { %130 = vmatpush1.msra.mxu0 %v111_v11  ;;  %420 = vmatpush3.msra.mxu1 %v116_v10  ;;  %v104_v22 = vld [vmem:[#allocation6 + $0xe8] sm:$0xff]  ;;  %v101_v25 = vld [vmem:[#allocation6 + $0xd0] sm:$0xff]  ;;  %v94_v27 = vld [vmem:[#allocation6 + $0x98] sm:$0xff] }
  0x26   :  { %131 = vmatprep.subr.mxu0 %v109_v12  ;;  %421 = vmatprep.subr.mxu1 %v113_v13  ;;  %v96_v26 = vld [vmem:[#allocation6 + $0xa8] sm:$0xff]  ;;  %v98_v28 = vld [vmem:[#allocation6 + $0xb8] sm:$0xff]  ;;  %v93_v29 = vld [vmem:[#allocation6 + $0x90] sm:$0xff] }
  0x27   :  { %132 = vmatpush1.msra.mxu0 %v108_v14  ;;  %422 = vmatpush3.msra.mxu1 %v113_v13  ;;  %v91_v30 = vld [vmem:[#allocation6 + $0x80] sm:$0xff]  ;;  %v90_v32 = vld [vmem:[#allocation6 + $0x78] sm:$0xff]  ;;  %v88_v33 = vld [vmem:[#allocation6 + $0x68] sm:$0xff] }
  0x28   :  { %133 = vmatprep.subr.mxu0 %v106_v15  ;;  %423 = vmatprep.subr.mxu1 %v110_v16  ;;  %v95_v31 = vld [vmem:[#allocation6 + $0xa0] sm:$0xff]  ;;  %v92_v34 = vld [vmem:[#allocation6 + $0x88] sm:$0xff]  ;;  %v85_v36 = vld [vmem:[#allocation6 + $0x50] sm:$0xff] }
  0x29   :  { %134 = vmatpush1.msra.mxu0 %v105_v17  ;;  %424 = vmatpush3.msra.mxu1 %v110_v16  ;;  %v87_v35 = vld [vmem:[#allocation6 + $0x60] sm:$0xff]  ;;  %v89_v37 = vld [vmem:[#allocation6 + $0x70] sm:$0xff]  ;;  %v84_v38 = vld [vmem:[#allocation6 + $0x48] sm:$0xff] }
  0x2a   :  { %135 = vmatprep.subr.mxu0 %v103_v18  ;;  %425 = vmatprep.subr.mxu1 %v107_v19  ;;  %v82_v39 = vld [vmem:[#allocation6 + $0x38] sm:$0xff]  ;;  %v81_v41 = vld [vmem:[#allocation6 + $0x30] sm:$0xff]  ;;  %v79_v42 = vld [vmem:[#allocation6 + $0x20] sm:$0xff] }
  0x2b   :  { %136 = vmatpush1.msra.mxu0 %v102_v20  ;;  %426 = vmatpush3.msra.mxu1 %v107_v19  ;;  %v86_v40 = vld [vmem:[#allocation6 + $0x58] sm:$0xff]  ;;  %v83_v43 = vld [vmem:[#allocation6 + $0x40] sm:$0xff]  ;;  %v76_v45 = vld [vmem:[#allocation6 + $0x8] sm:$0xff] }
  0x2c   :  { %137 = vmatprep.subr.mxu0 %v100_v21  ;;  %427 = vmatprep.subr.mxu1 %v104_v22  ;;  %v78_v44 = vld [vmem:[#allocation6 + $0x18] sm:$0xff]  ;;  %v80_v46 = vld [vmem:[#allocation6 + $0x28] sm:$0xff]  ;;  %v75_v47 = vld [vmem:[#allocation6] sm:$0xff] }
  0x2d   :  { %138 = vmatpush1.msra.mxu0 %v99_v23  ;;  %428 = vmatpush3.msra.mxu1 %v104_v22  ;;  %v71_v48 = vld [vmem:[#allocation3] sm:$0xff]  ;;  %v77_v49 = vld [vmem:[#allocation6 + $0x10] sm:$0xff]  ;;  %v72_v50 = vld [vmem:[#allocation3 + $0x8] sm:$0xff] }
  0x2e   :  { %139 = vmatprep.subr.mxu0 %v97_v24  ;;  %429 = vmatprep.subr.mxu1 %v101_v25  ;;  %v73_v51 = vld [vmem:[#allocation3 + $0x10] sm:$0xff]  ;;  %v74_v52 = vld [vmem:[#allocation3 + $0x18] sm:$0xff]  ;;  %v336_v56 = vld [vmem:[%s579_s2] sm:$0x7]  ;;  %s534_s2 = smov [#allocation8]  }
  0x2f   :  { %140 = vmatpush1.msra.mxu0 %v96_v26  ;;  %430 = vmatpush3.msra.mxu1 %v101_v25  ;;  %v341_v59 = vrot.slane %v336_v56, %v340_v55  ;;  %v345_v60 = vrot.slane %v336_v56, %v344_v57  ;;  %v349_v62 = vrot.slane %v336_v56, %v348_v58  ;;  %s382_s26 = sshll.u32 %s534_s2, 4  ;;  %s383_s26 = int_to_ptr.vmem [resolvable:$true] %s382_s26 }
  0x30   :  { %141 = vmatprep.subr.mxu0 %v94_v27  ;;  %431 = vmatprep.subr.mxu1 %v98_v28  ;;  %s501_s27 = scalar_lea.vmem %s383_s26, 1536  ;;  %p506_p11 = scmp.lt.s32.totalorder %s383_s26, %s383_s26 }
  0x31   :  { %142 = vmatpush1.msra.mxu0 %v93_v29  ;;  %432 = vmatpush3.msra.mxu1 %v98_v28  ;;  %p502_p10 = scmp.ne.s32.totalorder %s383_s26, %s501_s27  ;;  %p507_p12 = scmp.lt.s32.totalorder %s501_s27, %s501_s27 }
  0x32   :  { %143 = vmatprep.subr.mxu0 %v91_v30  ;;  %433 = vmatprep.subr.mxu1 %v95_v31 }
  0x33   :  { %144 = vmatpush1.msra.mxu0 %v90_v32  ;;  %434 = vmatpush3.msra.mxu1 %v95_v31  ;;  %p508_p13 = por %p507_p12, %p506_p11 }
  0x34   :  { %145 = vmatprep.subr.mxu0 %v88_v33  ;;  %435 = vmatprep.subr.mxu1 %v92_v34 }
  0x35   :  { %146 = vmatpush1.msra.mxu0 %v87_v35  ;;  %436 = vmatpush3.msra.mxu1 %v92_v34  ;;  %p509_p0 = pnand %p508_p13, %p502_p10 }
  0x36   :  { %147 = vmatprep.subr.mxu0 %v85_v36  ;;  %437 = vmatprep.subr.mxu1 %v89_v37 }
  0x37   :  { %148 = vmatpush1.msra.mxu0 %v84_v38  ;;  %438 = vmatpush3.msra.mxu1 %v89_v37 }
  0x38   :  { %149 = vmatprep.subr.mxu0 %v82_v39  ;;  %439 = vmatprep.subr.mxu1 %v86_v40 }
  0x39   :  { %150 = vmatpush1.msra.mxu0 %v81_v41  ;;  %440 = vmatpush3.msra.mxu1 %v86_v40 }
  0x3a   :  { %151 = vmatprep.subr.mxu0 %v79_v42  ;;  %441 = vmatprep.subr.mxu1 %v83_v43 }
  0x3b   :  { %152 = vmatpush1.msra.mxu0 %v78_v44  ;;  %442 = vmatpush3.msra.mxu1 %v83_v43 }
  0x3c   :  { %153 = vmatprep.subr.mxu0 %v76_v45  ;;  %443 = vmatprep.subr.mxu1 %v80_v46 }
  0x3d   :  { %154 = vmatpush1.msra.mxu0 %v75_v47  ;;  %444 = vmatpush3.msra.mxu1 %v80_v46 }
  0x3e   :  { %188 = vmatmul.mubr.f32.vlgmr.msra.gmra.mxu0 %v71_v48  ;;  %445 = vmatprep.subr.mxu1 %v77_v49 }
  0x3f   :  { %193 = vmatprep.mubr.f32.mxu0 %v533_v0  ;;  %446 = vmatpush3.msra.mxu1 %v77_v49 }
  0x40   :  { %447 = vmatprep.mubr.f32.mxu1 %v71_v48 }
  0x41   :  { %448 = vmatmul.mubr.f32.vlgmr.msra.gmra.mxu1 %v72_v50 }
  0x42   :  { %194 = vmatmul.mubr.f32.gmra.mxu0 %v72_v50  ;;  %450 = vmatprep.mubr.f32.mxu1 %v73_v51 }
  0x43   :  { %199 = vmatprep.mubr.f32.mxu0 %v533_v0 }
  0x45   :  { %451 = vmatmul.mubr.f32.gmra.mxu1 %v74_v52 }
  0x46   :  { %200 = vmatmul.mubr.f32.gmra.mxu0 %v73_v51 }
  0x47   :  { %205 = vmatprep.mubr.f32.mxu0 %v533_v0 }
  0x4a   :  { %206 = vmatmul.mubr.f32.gmra.mxu0 %v74_v52 }
  0xfe   :  { %v189_v61 = vpop.f32.mrf.mxu0 }
  0xff   :  { %v353_v63 = vadd.f32 %v341_v59, %v189_v61 }
 0x100   :  { %v191_v1 = vpop.f32.mrf.mxu0 }
 0x101   :  { %365 = vst [vmem:[#allocation8] sm:$0xff] %v353_v63  ;;  %v354_v2 = vadd.f32 %v345_v60, %v191_v1  ;;  %v449_v3 = vpop.f32.mrf.mxu1 }
 0x102   :  { %v195_v0 = vpop.f32.mrf.mxu0  ;;  %v358_v4 = vadd.f32 %v449_v3, %v349_v62 }
 0x103   :  { %366 = vst [vmem:[#allocation8 + $0x8] sm:$0xff] %v354_v2  ;;  %v356_v5 = vadd.f32 %v341_v59, %v195_v0  ;;  %v278_v6 = vpop.f32.mrf.mxu1 }
 0x104   :  { %v197_v7 = vpop.f32.mrf.mxu0  ;;  %370 = vst [vmem:[#allocation8 + $0x28] sm:$0xff] %v358_v4  ;;  %v355_v8 = vadd.f32 %v349_v62, %v278_v6 }
 0x105   :  { %368 = vst [vmem:[#allocation8 + $0x18] sm:$0xff] %v356_v5  ;;  %v357_v9 = vadd.f32 %v345_v60, %v197_v7  ;;  %v452_v10 = vpop.f32.mrf.mxu1 }
 0x106   :  { %v201_v11 = vpop.f32.mrf.mxu0  ;;  %367 = vst [vmem:[#allocation8 + $0x10] sm:$0xff] %v355_v8  ;;  %v364_v12 = vadd.f32 %v452_v10, %v349_v62 }
 0x107   :  { %369 = vst [vmem:[#allocation8 + $0x20] sm:$0xff] %v357_v9  ;;  %v359_v13 = vadd.f32 %v341_v59, %v201_v11  ;;  %v288_v14 = vpop.f32.mrf.mxu1 }
 0x108   :  { %v203_v15 = vpop.f32.mrf.mxu0  ;;  %376 = vst [vmem:[#allocation8 + $0x58] sm:$0xff] %v364_v12  ;;  %v361_v16 = vadd.f32 %v349_v62, %v288_v14 }
 0x109   :  { %371 = vst [vmem:[#allocation8 + $0x30] sm:$0xff] %v359_v13  ;;  %v360_v17 = vadd.f32 %v345_v60, %v203_v15 }
 0x10a   :  { %v207_v18 = vpop.f32.mrf.mxu0  ;;  %373 = vst [vmem:[#allocation8 + $0x40] sm:$0xff] %v361_v16 }
 0x10b   :  { %372 = vst [vmem:[#allocation8 + $0x38] sm:$0xff] %v360_v17  ;;  %v362_v19 = vadd.f32 %v341_v59, %v207_v18 }
 0x10c   :  { %v209_v20 = vpop.f32.mrf.mxu0 }
 0x10d   :  { %374 = vst [vmem:[#allocation8 + $0x48] sm:$0xff] %v362_v19  ;;  %v363_v21 = vadd.f32 %v345_v60, %v209_v20 }
 0x10f   :  { %375 = vst [vmem:[#allocation8 + $0x50] sm:$0xff] %v363_v21 }
 0x110   :  { %512 = shalt.err (!%p509_p0)
}
 0x111   :  { %388 = dma.vmem_to_hbm [thread:$0]  %s383_s26, 1536, %s580_s3, [#allocation5], %s531_s22, %s531_s22, %s532_s23  }
 0x112   :  { %525 = dma.done.wait [#allocation5], 1536  }
 0x113   :  { %526 = vsyncadd [#allocation5], 4294965760 }
 0x114   :  { %392 = vsyncpa [#allocation4], 1 }
 0x115   :  { %393 = vsyncpa [#allocation7], 1 }
 0x116   :  { %394 = vsyncpa [#allocation5], 1 }

</bundles_post_ra>
